<compile_context>
chip_gen: v7x
topology: tpu7x:2x2x1
jax: 0.10.0
libtpu: 0.0.40
codegen_flags: <defaults>
</compile_context>

<pallas_src>
import jax
import jax.numpy as jnp
from jax.experimental import pallas as pl
from jax.experimental.pallas import tpu as pltpu

HIDDEN1 = 128
HIDDEN2 = 64


def mlp_kernel(x_ref, w1_ref, b1_ref, w2_ref, b2_ref, w3_ref, b3_ref, o_ref):
    # Whole hot path (three MXU matmuls + bias adds + ReLUs) on one VMEM-resident tile.
    x = x_ref[...].astype(jnp.bfloat16)                                         # f32 -> bf16 on VPU
    h1 = jnp.dot(x, w1_ref[...], preferred_element_type=jnp.float32) + b1_ref[...]
    h1 = jnp.maximum(h1, 0.0).astype(jnp.bfloat16)                              # (bb, H1)
    h2 = jnp.dot(h1, w2_ref[...], preferred_element_type=jnp.float32) + b2_ref[...]
    h2 = jnp.maximum(h2, 0.0).astype(jnp.bfloat16)                              # (bb, H2)
    o_ref[...] = (jnp.dot(h2, w3_ref[...], preferred_element_type=jnp.float32)
                  + b3_ref[...]).astype(o_ref.dtype)                            # (bb, D_out_pad)


def mlp_forward(x, params, *, block_b=None, out_dtype=jnp.float32):
    """x: (B, input_size) float32. params: dict of w1,b1,w2,b2,w3,b3 (f32).

    block_b=None -> single grid step (best on single-TC v5e/v6e for batches up to a few
    thousand).  On v7x pass block_b such that cdiv(B, block_b) >= 4 so each TensorCore
    gets >= 2 pipelined steps.
    """
    B, D_in = x.shape
    w1 = params["w1"].astype(jnp.bfloat16)
    w2 = params["w2"].astype(jnp.bfloat16)
    w3 = params["w3"].astype(jnp.bfloat16)
    b1, b2, b3 = params["b1"], params["b2"], params["b3"]          # biases stay f32
    H1 = w1.shape[1]
    H2 = w2.shape[1]
    D_out = w3.shape[1]

    # Lane-dense output: pad fc3 to a multiple of 128 output lanes (zero columns are
    # inert: zero weights + zero bias), slice the real columns off after the call.
    D_out_p = pl.cdiv(D_out, 128) * 128
    if D_out_p != D_out:
        w3 = jnp.pad(w3, ((0, 0), (0, D_out_p - D_out)))
        b3 = jnp.pad(b3, ((0, 0), (0, D_out_p - D_out)))

    # Grid-step choice (see docstring).  block_b must be a multiple of 8 (sublane) or
    # equal the (padded) batch.
    if block_b is None:
        block_b = B if B <= 4096 else 1024
    block_b = min(block_b, B)
    if block_b < B and block_b % 8 != 0:
        block_b = ((block_b + 7) // 8) * 8

    num_tiles = pl.cdiv(B, block_b)
    B_pad = num_tiles * block_b
    if B_pad != B:
        x = jnp.pad(x, ((0, B_pad - B), (0, 0)))                   # zero rows, never returned

    out_bytes = jnp.dtype(out_dtype).itemsize
    flops = 2 * B_pad * (D_in * H1 + H1 * H2 + H2 * D_out_p)
    bytes_accessed = (
        B_pad * D_in * 4                                           # x stream (f32 in)
        + B_pad * D_out_p * out_bytes                              # padded output
        + (D_in * H1 + H1 * H2 + H2 * D_out_p) * 2                 # resident bf16 weights
        + (H1 + H2 + D_out_p) * 4                                  # f32 biases
    )

    out = pl.pallas_call(
        mlp_kernel,
        out_shape=jax.ShapeDtypeStruct((B_pad, D_out_p), out_dtype),
        grid_spec=pl.GridSpec(
            grid=(num_tiles,),
            in_specs=[
                pl.BlockSpec((block_b, D_in), lambda i: (i, 0)),   # x tile over batch
                pl.BlockSpec((D_in, H1), lambda i: (0, 0)),        # w1 (resident)
                pl.BlockSpec((1, H1), lambda i: (0, 0)),           # b1
                pl.BlockSpec((H1, H2), lambda i: (0, 0)),          # w2
                pl.BlockSpec((1, H2), lambda i: (0, 0)),           # b2
                pl.BlockSpec((H2, D_out_p), lambda i: (0, 0)),     # w3 (lane-padded)
                pl.BlockSpec((1, D_out_p), lambda i: (0, 0)),      # b3 (lane-padded)
            ],
            out_specs=pl.BlockSpec((block_b, D_out_p), lambda i: (i, 0)),
        ),
        compiler_params=pltpu.CompilerParams(
            dimension_semantics=("parallel",),                     # shard batch tiles on v7x
        ),
        cost_estimate=pl.CostEstimate(
            flops=flops, transcendentals=0, bytes_accessed=bytes_accessed),
    )(x, w1, b1, w2, b2, w3, b3)

    return out[:B, :D_out]


def init_params(key, input_size, hidden1, hidden2, output_size):
    """Deterministic init mimicking nn.Linear's U(-1/sqrt(fan_in), 1/sqrt(fan_in))."""
    keys = jax.random.split(key, 6)

    def linear(kw, kb, fan_in, fan_out):
        bound = 1.0 / jnp.sqrt(jnp.float32(fan_in))
        w = jax.random.uniform(kw, (fan_in, fan_out), jnp.float32, -bound, bound)
        b = jax.random.uniform(kb, (1, fan_out), jnp.float32, -bound, bound)
        return w, b

    w1, b1 = linear(keys[0], keys[1], input_size, hidden1)
    w2, b2 = linear(keys[2], keys[3], hidden1, hidden2)
    w3, b3 = linear(keys[4], keys[5], hidden2, output_size)
    return {"w1": w1, "b1": b1, "w2": w2, "b2": b2, "w3": w3, "b3": b3}


def mlp_reference_bf16(x, p):
    """Mirrors the kernel's dtype handling exactly (bf16 operands, f32 accumulation)."""
    xb = x.astype(jnp.bfloat16)
    w1 = p["w1"].astype(jnp.bfloat16)
    w2 = p["w2"].astype(jnp.bfloat16)
    w3 = p["w3"].astype(jnp.bfloat16)
    h1 = jnp.maximum(jnp.dot(xb, w1, preferred_element_type=jnp.float32) + p["b1"], 0.0)
    h1 = h1.astype(jnp.bfloat16)
    h2 = jnp.maximum(jnp.dot(h1, w2, preferred_element_type=jnp.float32) + p["b2"], 0.0)
    h2 = h2.astype(jnp.bfloat16)
    return jnp.dot(h2, w3, preferred_element_type=jnp.float32) + p["b3"]


def mlp_reference_f32(x, p):
    h1 = jnp.maximum(x @ p["w1"] + p["b1"], 0.0)
    h2 = jnp.maximum(h1 @ p["w2"] + p["b2"], 0.0)
    return h2 @ p["w3"] + p["b3"]


if __name__ == "__main__":
    key = jax.random.PRNGKey(0)
    k_x, k_p = jax.random.split(key)

    batch = 8             # small deterministic test; single grid step (best for v5e/v6e)
    input_size = 32
    output_size = 16

    x = jax.random.normal(k_x, (batch, input_size), dtype=jnp.float32)
    params = init_params(k_p, input_size, HIDDEN1, HIDDEN2, output_size)

    out = jax.block_until_ready(mlp_forward(x, params))

    ref_bf16 = mlp_reference_bf16(x, params)
    ref_f32 = mlp_reference_f32(x, params)
    assert out.shape == (batch, output_size), out.shape
    assert jnp.allclose(out, ref_bf16, atol=2e-3, rtol=2e-3), "mismatch vs bf16-mirrored reference"
    assert jnp.allclose(out, ref_f32, atol=3e-2, rtol=3e-2), "mismatch vs f32 reference"

    print("KERNEL_OK")
</pallas_src>

<mosaic_0001>
module attributes {stable_mosaic.version = 11 : i64} {
  func.func @mlp_kernel(%arg0: i32, %arg1: memref<8x32xf32, #tpu.memory_space<vmem>>, %arg2: memref<32x128xbf16, #tpu.memory_space<vmem>>, %arg3: memref<1x128xf32, #tpu.memory_space<vmem>>, %arg4: memref<128x64xbf16, #tpu.memory_space<vmem>>, %arg5: memref<1x64xf32, #tpu.memory_space<vmem>>, %arg6: memref<64x128xbf16, #tpu.memory_space<vmem>>, %arg7: memref<1x128xf32, #tpu.memory_space<vmem>>, %arg8: memref<8x128xf32, #tpu.memory_space<vmem>>) attributes {dimension_semantics = [#tpu.dimension_semantics<parallel>], iteration_bounds = array<i64: 1>, scalar_prefetch = 0 : i64, scratch_operands = 0 : i64, tpu.core_type = #tpu.core_type<tc>, window_params = [{transform_indices = @transform_0, window_bounds = array<i64: 8, 32>}, {pipeline_mode = #tpu.pipeline_mode<synchronous>, transform_indices = @transform_1, window_bounds = array<i64: 32, 128>}, {pipeline_mode = #tpu.pipeline_mode<synchronous>, transform_indices = @transform_2, window_bounds = array<i64: 1, 128>}, {pipeline_mode = #tpu.pipeline_mode<synchronous>, transform_indices = @transform_3, window_bounds = array<i64: 128, 64>}, {pipeline_mode = #tpu.pipeline_mode<synchronous>, transform_indices = @transform_4, window_bounds = array<i64: 1, 64>}, {pipeline_mode = #tpu.pipeline_mode<synchronous>, transform_indices = @transform_5, window_bounds = array<i64: 64, 128>}, {pipeline_mode = #tpu.pipeline_mode<synchronous>, transform_indices = @transform_6, window_bounds = array<i64: 1, 128>}, {transform_indices = @transform_7, window_bounds = array<i64: 8, 128>}]} {
    %c0 = arith.constant 0 : index
    %c0_0 = arith.constant 0 : index
    %0 = vector.load %arg1[%c0, %c0_0] : memref<8x32xf32, #tpu.memory_space<vmem>>, vector<8x32xf32>
    %1 = arith.truncf %0 : vector<8x32xf32> to vector<8x32xbf16>
    %c0_1 = arith.constant 0 : index
    %c0_2 = arith.constant 0 : index
    %2 = vector.load %arg2[%c0_1, %c0_2] : memref<32x128xbf16, #tpu.memory_space<vmem>>, vector<32x128xbf16>
    %cst = arith.constant dense<0.000000e+00> : vector<8x128xf32>
    %3 = tpu.matmul %1, %2, %cst {dimension_numbers = #tpu.dot_dimension_numbers<[1], [0], [0], [1], [0, 0, 1, 1], [], []>} : vector<8x32xbf16>, vector<32x128xbf16>, vector<8x128xf32> -> vector<8x128xf32>
    %c0_3 = arith.constant 0 : index
    %c0_4 = arith.constant 0 : index
    %4 = vector.load %arg3[%c0_3, %c0_4] : memref<1x128xf32, #tpu.memory_space<vmem>>, vector<1x128xf32>
    %5 = vector.broadcast %4 : vector<1x128xf32> to vector<8x128xf32>
    %6 = arith.addf %3, %5 : vector<8x128xf32>
    %cst_5 = arith.constant 0.000000e+00 : f32
    %7 = vector.broadcast %cst_5 : f32 to vector<8x128xf32>
    %8 = arith.maximumf %6, %7 : vector<8x128xf32>
    %9 = arith.truncf %8 : vector<8x128xf32> to vector<8x128xbf16>
    %c0_6 = arith.constant 0 : index
    %c0_7 = arith.constant 0 : index
    %10 = vector.load %arg4[%c0_6, %c0_7] : memref<128x64xbf16, #tpu.memory_space<vmem>>, vector<128x64xbf16>
    %cst_8 = arith.constant dense<0.000000e+00> : vector<8x64xf32>
    %11 = tpu.matmul %9, %10, %cst_8 {dimension_numbers = #tpu.dot_dimension_numbers<[1], [0], [0], [1], [0, 0, 1, 1], [], []>} : vector<8x128xbf16>, vector<128x64xbf16>, vector<8x64xf32> -> vector<8x64xf32>
    %c0_9 = arith.constant 0 : index
    %c0_10 = arith.constant 0 : index
    %12 = vector.load %arg5[%c0_9, %c0_10] : memref<1x64xf32, #tpu.memory_space<vmem>>, vector<1x64xf32>
    %13 = vector.broadcast %12 : vector<1x64xf32> to vector<8x64xf32>
    %14 = arith.addf %11, %13 : vector<8x64xf32>
    %cst_11 = arith.constant 0.000000e+00 : f32
    %15 = vector.broadcast %cst_11 : f32 to vector<8x64xf32>
    %16 = arith.maximumf %14, %15 : vector<8x64xf32>
    %17 = arith.truncf %16 : vector<8x64xf32> to vector<8x64xbf16>
    %c0_12 = arith.constant 0 : index
    %c0_13 = arith.constant 0 : index
    %18 = vector.load %arg6[%c0_12, %c0_13] : memref<64x128xbf16, #tpu.memory_space<vmem>>, vector<64x128xbf16>
    %cst_14 = arith.constant dense<0.000000e+00> : vector<8x128xf32>
    %19 = tpu.matmul %17, %18, %cst_14 {dimension_numbers = #tpu.dot_dimension_numbers<[1], [0], [0], [1], [0, 0, 1, 1], [], []>} : vector<8x64xbf16>, vector<64x128xbf16>, vector<8x128xf32> -> vector<8x128xf32>
    %c0_15 = arith.constant 0 : index
    %c0_16 = arith.constant 0 : index
    %20 = vector.load %arg7[%c0_15, %c0_16] : memref<1x128xf32, #tpu.memory_space<vmem>>, vector<1x128xf32>
    %21 = vector.broadcast %20 : vector<1x128xf32> to vector<8x128xf32>
    %22 = arith.addf %19, %21 : vector<8x128xf32>
    %c0_17 = arith.constant 0 : index
    %c0_18 = arith.constant 0 : index
    %23 = vector.load %arg8[%c0_17, %c0_18] : memref<8x128xf32, #tpu.memory_space<vmem>>, vector<8x128xf32>
    tpu.vector_store %arg8[%c0_17, %c0_18], %22 {strides = array<i32>} : memref<8x128xf32, #tpu.memory_space<vmem>>, vector<8x128xf32>,
    return
  }
  func.func @transform_0(%arg0: i32) -> (i32, i32) {
    %c0_i32 = arith.constant 0 : i32
    %c0_i32_0 = arith.constant 0 : i32
    return %arg0, %c0_i32 : i32, i32
  }
  func.func @transform_1(%arg0: i32) -> (i32, i32) {
    %c0_i32 = arith.constant 0 : i32
    %c0_i32_0 = arith.constant 0 : i32
    %c0_i32_1 = arith.constant 0 : i32
    return %c0_i32, %c0_i32_0 : i32, i32
  }
  func.func @transform_2(%arg0: i32) -> (i32, i32) {
    %c0_i32 = arith.constant 0 : i32
    %c0_i32_0 = arith.constant 0 : i32
    %c0_i32_1 = arith.constant 0 : i32
    return %c0_i32, %c0_i32_0 : i32, i32
  }
  func.func @transform_3(%arg0: i32) -> (i32, i32) {
    %c0_i32 = arith.constant 0 : i32
    %c0_i32_0 = arith.constant 0 : i32
    %c0_i32_1 = arith.constant 0 : i32
    return %c0_i32, %c0_i32_0 : i32, i32
  }
  func.func @transform_4(%arg0: i32) -> (i32, i32) {
    %c0_i32 = arith.constant 0 : i32
    %c0_i32_0 = arith.constant 0 : i32
    %c0_i32_1 = arith.constant 0 : i32
    return %c0_i32, %c0_i32_0 : i32, i32
  }
  func.func @transform_5(%arg0: i32) -> (i32, i32) {
    %c0_i32 = arith.constant 0 : i32
    %c0_i32_0 = arith.constant 0 : i32
    %c0_i32_1 = arith.constant 0 : i32
    return %c0_i32, %c0_i32_0 : i32, i32
  }
  func.func @transform_6(%arg0: i32) -> (i32, i32) {
    %c0_i32 = arith.constant 0 : i32
    %c0_i32_0 = arith.constant 0 : i32
    %c0_i32_1 = arith.constant 0 : i32
    return %c0_i32, %c0_i32_0 : i32, i32
  }
  func.func @transform_7(%arg0: i32) -> (i32, i32) {
    %c0_i32 = arith.constant 0 : i32
    %c0_i32_0 = arith.constant 0 : i32
    return %arg0, %c0_i32 : i32, i32
  }
}

</mosaic_0001>

<bundles_post_ra>
// kernel: tpu_custom_call.1
= control target key start
LH: loop header
LB: loop body
LE: loop exit
PB: predicated region body
PF: predicated region fallthrough
CT: control target
= control target key end

     0   :  { %v427_v1 = vmov 0.0   ;;  %vm428_vm0 = vmmov 0   ;;  %vm53_vm1 = vcmask 261120   ;;  %s539_s0 = inlined_call_operand.vmem [shape: f32[8,32], index: 0, kind: input, shape index: {}]   ;;  %s540_s1 = inlined_call_operand.vmem [shape: bf16[32,128], index: 1, kind: input, shape index: {}]   ;;  %s541_s2 = inlined_call_operand.vmem [shape: f32[1,128], index: 2, kind: input, shape index: {}]   ;;  %s542_s3 = inlined_call_operand.vmem [shape: bf16[128,64], index: 3, kind: input, shape index: {}]   ;;  %s543_s4 = inlined_call_operand.vmem [shape: f32[1,64], index: 4, kind: input, shape index: {}]   ;;  %s544_s5 = inlined_call_operand.vmem [shape: bf16[64,128], index: 5, kind: input, shape index: {}]   ;;  %s545_s6 = inlined_call_operand.vmem [shape: f32[1,128], index: 6, kind: input, shape index: {}]   ;;  %s546_s7 = inlined_call_operand.hbm [shape: f32[8,128], index: 7, kind: output, shape index: {}]  }
   0x1   :  { %v389_v0 = vld [vmem:[%s540_s1] sm:$0xff]   ;;  %346 = vmatprep.subr.bf16.mxu0 %v427_v1  ;;  %v390_v2 = vld [vmem:[%s540_s1 + $0x8] sm:$0xff]   ;;  %354 = vmatprep.subr.bf16.mxu1 %v427_v1  ;;  %v393_v7 = vld [vmem:[%s542_s3 + $0x10] sm:$0xff]  }
   0x2   :  { %347 = vmatpush3.bf16.msra.mxu0 %v389_v0  ;;  %350 = vmatprep.mubr.msk.bf16.mxu0 %vm428_vm0, %v427_v1  ;;  %v28_v3 = vld [vmem:[%s539_s0] sm:$0xff]  ;;  %v392_v6 = vld [vmem:[%s542_s3 + $0x8] sm:$0xff]  }
   0x3   :  { %348 = vmatprep.subr.bf16.mxu0 %v427_v1  ;;  %v391_v4 = vld [vmem:[%s542_s3] sm:$0xff]   ;;  %370 = vmatprep.mubr.msk.bf16.mxu1 %vm428_vm0, %v427_v1  ;;  %v29_v5 = vpack.c.bf16 %v28_v3, %v28_v3 }
   0x4   :  { %355 = vmatpush3.bf16.msra.mxu1 %v391_v4 }
   0x5   :  { %356 = vmatprep.subr.bf16.mxu1 %v427_v1 }
   0x6   :  { %349 = vmatpush3.bf16.msra.mxu0 %v390_v2 }
   0x7   :  { %374 = vmatprep.subr.bf16.mxu0 %v427_v1 }
   0x8   :  { %357 = vmatpush3.bf16.msra.mxu1 %v392_v6 }
   0x9   :  { %351 = vmatmul.mubr.msk.bf16.vlgmr.msra.gmra.mrb[0].mxu0 %vm53_vm1, %v29_v5  ;;  %358 = vmatprep.subr.bf16.mxu1 %v427_v1 }
   0xa   :  { %382 = vmatprep.mubr.msk.bf16.mxu0 %vm428_vm0, %v427_v1 }
   0xb   :  { %12 = vsyncpa [#allocation3], 0  ;;  %v394_v8 = vld [vmem:[%s542_s3 + $0x18] sm:$0xff]   ;;  %v395_v9 = vld [vmem:[%s542_s3 + $0x20] sm:$0xff]   ;;  %vm251_vm2 = vcmask 523264   ;;  %s429_s1 = smov [#allocation2]  }
   0xc   :  { %359 = vmatpush3.bf16.msra.mxu1 %v393_v7  ;;  %v396_v10 = vld [vmem:[%s542_s3 + $0x28] sm:$0xff]   ;;  %v397_v11 = vld [vmem:[%s542_s3 + $0x30] sm:$0xff]   ;;  %v398_v12 = vld [vmem:[%s542_s3 + $0x38] sm:$0xff]  }
   0xd   :  { %360 = vmatprep.subr.bf16.mxu1 %v427_v1  ;;  %v399_v13 = vld [vmem:[%s544_s5] sm:$0xff]   ;;  %v400_v14 = vld [vmem:[%s544_s5 + $0x8] sm:$0xff]   ;;  %v401_v23 = vld [vmem:[%s544_s5 + $0x10] sm:$0xff]  }
   0xe   :  { %375 = vmatpush3.bf16.msra.mxu0 %v399_v13  ;;  %v310_v15 = vld [vmem:[%s541_s2] ss:$0 sm:$0xff]  ;;  %v402_v24 = vld [vmem:[%s544_s5 + $0x18] sm:$0xff]   ;;  %s302_s5 = sshll.u32 %s429_s1, 4  ;;  %s303_s5 = int_to_ptr.vmem [resolvable:$true] %s302_s5 }
   0xf   :  { %376 = vmatprep.subr.bf16.mxu0 %v427_v1  ;;  %v314_v25 = vld [vmem:[%s543_s4] ss:$0 sm:$0xff]  ;;  %s403_s4 = scalar_lea.vmem %s303_s5, 128  ;;  %p408_p1 = scmp.lt.s32.totalorder %s303_s5, %s303_s5 }
  0x10   :  { %361 = vmatpush3.bf16.msra.mxu1 %v394_v8  ;;  %v323_v33 = vld [vmem:[%s545_s6] ss:$0 sm:$0xff]  ;;  %p404_p0 = scmp.ne.s32.totalorder %s303_s5, %s403_s4  ;;  %p409_p2 = scmp.lt.s32.totalorder %s403_s4, %s403_s4 }
  0x11   :  { %362 = vmatprep.subr.bf16.mxu1 %v427_v1 }
  0x12   :  { %377 = vmatpush3.bf16.msra.mxu0 %v400_v14  ;;  %p410_p3 = por %p409_p2, %p408_p1 }
  0x13   :  { %378 = vmatprep.subr.bf16.mxu0 %v427_v1 }
  0x14   :  { %363 = vmatpush3.bf16.msra.mxu1 %v395_v9  ;;  %p411_p4 = pnand %p410_p3, %p404_p0 }
  0x15   :  { %364 = vmatprep.subr.bf16.mxu1 %v427_v1 }
  0x16   :  { %379 = vmatpush3.bf16.msra.mxu0 %v401_v23 }
  0x17   :  { %380 = vmatprep.subr.bf16.mxu0 %v427_v1 }
  0x18   :  { %365 = vmatpush3.bf16.msra.mxu1 %v396_v10 }
  0x19   :  { %366 = vmatprep.subr.bf16.mxu1 %v427_v1 }
  0x1a   :  { %381 = vmatpush3.bf16.msra.mxu0 %v402_v24 }
  0x1c   :  { %367 = vmatpush3.bf16.msra.mxu1 %v397_v11 }
  0x1d   :  { %368 = vmatprep.subr.bf16.mxu1 %v427_v1 }
  0x20   :  { %369 = vmatpush3.bf16.msra.mxu1 %v398_v12 }
  0xdc   :  { %v91_v16 = vpop.f32.mrb[0].mxu0 }
  0xdd   :  { %v92_v17 = vadd.f32 %v310_v15, %v91_v16  ;;  %v352_v18 = vpop.f32.mrb[1].mxu0 }
  0xde   :  { %v94_v19 = vpop.f32.mrb[2].mxu0 }
  0xdf   :  { %v97_v20 = vmax.f32 %v92_v17, 0.0  ;;  %v353_v21 = vpop.f32.mrb[3].mxu0 }
  0xe1   :  { %v98_v22 = vpack.c.bf16 %v97_v20, %v97_v20 }
  0xe3   :  { %371 = vmatmul.mubr.bf16.vlgmr.msra.gmra.mrb[0].mxu1 %v98_v22 }
 0x1b6   :  { %v204_v26 = vpop.f32.mrb[0].mxu1 }
 0x1b7   :  { %v205_v27 = vadd.f32 %v314_v25, %v204_v26  ;;  %v372_v28 = vpop.f32.mrb[1].mxu1 }
 0x1b8   :  { %v207_v29 = vpop.f32.mrb[2].mxu1 }
 0x1b9   :  { %v210_v30 = vmax.f32 %v205_v27, 0.0  ;;  %v373_v31 = vpop.f32.mrb[3].mxu1 }
 0x1bb   :  { %v211_v32 = vpack.c.bf16 %v210_v30, %v210_v30 }
 0x1bd   :  { %383 = vmatmul.mubr.msk.bf16.vlgmr.msra.gmra.mrb[4].mxu0 %vm251_vm2, %v211_v32 }
 0x290   :  { %v289_v34 = vpop.f32.mrb[4].mxu0 }
 0x291   :  { %v290_v35 = vadd.f32 %v323_v33, %v289_v34  ;;  %v384_v36 = vpop.f32.mrb[5].mxu0 }
 0x292   :  { %v292_v37 = vpop.f32.mrb[6].mxu0 }
 0x293   :  { %295 = vst [vmem:[#allocation2] sm:$0xff] %v290_v35  ;;  %v385_v38 = vpop.f32.mrb[7].mxu0 }
 0x294   :  { %414 = shalt.err (!%p411_p4)
}
 0x295   :  { %s415_s6 = scalar_lea.hbm %s546_s7, 128 }
 0x296   :  { %p416_p5 = scmp.ne.s32.totalorder %s546_s7, %s415_s6  ;;  %p419_p6 = scmp.lt.u32.totalorder %s415_s6, %s546_s7 }
 0x298   :  { %p421_p7 = pnand %p419_p6, %p416_p5 }
 0x29a   :  { %424 = shalt.err (!%p421_p7)
}
 0x29b   :  { %305 = dma.vmem_to_hbm [thread:$0]  %s303_s5, 128, %s546_s7, [#allocation3]  }
 0x29c   :  { %425 = dma.done.wait [#allocation3], 128  }
 0x29d   :  { %426 = vsyncadd [#allocation3], 4294967168 }
 0x29e   :  { %309 = vsyncpa [#allocation3], 1 }

</bundles_post_ra>
